<compile_context>
chip_gen: v6e
topology: v6e:2x2x1
jax: 0.10.0
libtpu: 0.0.40
codegen_flags: <defaults>
</compile_context>

<pallas_src>
import math

import jax
import jax.numpy as jnp
import numpy as np
from jax.experimental import pallas as pl
from jax.experimental.pallas import tpu as pltpu

_LANE = 128
_SUBLANE = 8


def _interp_kernel(a_ref, b_ref, da_ref, db_ref, x0_ref, x1_ref, xt_ref, dxt_ref):
    # Coefficient blocks are (B_t, 1, 1) float32; data blocks are (B_t, R_t, 128).
    x0 = x0_ref[...].astype(jnp.float32)
    x1 = x1_ref[...].astype(jnp.float32)
    a = a_ref[...]
    b = b_ref[...]
    da = da_ref[...]
    db = db_ref[...]
    xt_ref[...] = (a * x1 + b * x0).astype(xt_ref.dtype)
    dxt_ref[...] = (da * x1 + db * x0).astype(dxt_ref.dtype)


def _coefficients(t32, scheme: str):
    """Per-batch (a, b, da, db) in float32, matching AffineInterp.get_coeffs."""
    name = scheme.lower()
    if name in ("straight", "lerp"):
        a = t32
        b = 1.0 - t32
        da = jnp.ones_like(t32)
        db = -jnp.ones_like(t32)
    elif name in ("spherical", "slerp"):
        h = math.pi / 2.0
        a = jnp.sin(h * t32)
        b = jnp.cos(h * t32)
        da = h * jnp.cos(h * t32)
        db = -h * jnp.sin(h * t32)
    elif name in ("ddim", "ddpm"):
        ca, cb = 19.9, 0.1

        def alpha_fn(s):
            return jnp.exp(-ca * (1.0 - s) ** 2 / 4.0 - cb * (1.0 - s) / 2.0)

        def beta_fn(s):
            return jnp.sqrt(1.0 - alpha_fn(s) ** 2)

        # Derivatives via autodiff, mirroring AffineInterp.value_and_grad.
        a, da = jax.vmap(jax.value_and_grad(alpha_fn))(t32)
        b, db = jax.vmap(jax.value_and_grad(beta_fn))(t32)
    else:
        raise ValueError(f"unknown interpolation scheme {scheme!r}")
        # TODO(synk): custom user-supplied alpha/beta callables are not supported here.
    return a, b, da, db


def _choose_block(B, R, itemsize, target_bytes):
    """Pick (B_t, R_t) so B_t*R_t*128*itemsize ~ target_bytes (per-array block)."""
    target_rows = max(1, target_bytes // (itemsize * _LANE))
    if R <= target_rows:
        # Small feature dim: take all of R and fold batch rows into the tile.
        R_t = R
        B_t = max(1, min(B, target_rows // max(R, 1)))
    else:
        # Large feature dim: one batch row per tile, chunk R (multiple of 8).
        B_t = 1
        if R <= _SUBLANE:
            R_t = R
        else:
            R_t = max(_SUBLANE, (min(R, target_rows) // _SUBLANE) * _SUBLANE)
    return B_t, R_t


def affine_interp_forward(x_0, x_1, t, scheme: str = "straight",
                          *, target_block_bytes: int = 1 << 20):
    """Pallas equivalent of AffineInterp(name=scheme).forward(x_0, x_1, t)."""
    assert x_0.shape == x_1.shape and x_0.dtype == x_1.dtype
    orig_shape = x_0.shape
    dtype = x_0.dtype
    B = orig_shape[0]
    D = int(np.prod(orig_shape[1:])) if len(orig_shape) > 1 else 1

    # t and coefficients in float32 regardless of data dtype.
    t32 = jnp.asarray(t, dtype=jnp.float32).reshape(-1)
    if t32.shape[0] == 1 and B != 1:
        t32 = jnp.broadcast_to(t32, (B,))
    assert t32.shape[0] == B, "t must be a scalar or have one entry per batch element"
    a_t, b_t, da_t, db_t = _coefficients(t32, scheme)
    a3 = a_t.reshape(B, 1, 1)
    b3 = b_t.reshape(B, 1, 1)
    da3 = da_t.reshape(B, 1, 1)
    db3 = db_t.reshape(B, 1, 1)

    # Flatten non-batch dims; pad the lane dim to a multiple of 128 if needed.
    x0f = x_0.reshape(B, D)
    x1f = x_1.reshape(B, D)
    D_pad = pl.cdiv(D, _LANE) * _LANE
    if D_pad != D:
        pad = ((0, 0), (0, D_pad - D))
        x0f = jnp.pad(x0f, pad)
        x1f = jnp.pad(x1f, pad)
    R = D_pad // _LANE
    x0v = x0f.reshape(B, R, _LANE)
    x1v = x1f.reshape(B, R, _LANE)

    itemsize = jnp.dtype(dtype).itemsize
    B_t, R_t = _choose_block(B, R, itemsize, target_block_bytes)

    data_spec = pl.BlockSpec((B_t, R_t, _LANE), lambda bi, ri: (bi, ri, 0))
    coef_spec = pl.BlockSpec((B_t, 1, 1), lambda bi, ri: (bi, 0, 0))
    grid = (pl.cdiv(B, B_t), pl.cdiv(R, R_t))

    xt, dxt = pl.pallas_call(
        _interp_kernel,
        out_shape=[
            jax.ShapeDtypeStruct((B, R, _LANE), dtype),
            jax.ShapeDtypeStruct((B, R, _LANE), dtype),
        ],
        grid_spec=pltpu.PrefetchScalarGridSpec(
            num_scalar_prefetch=0,
            grid=grid,
            in_specs=[coef_spec, coef_spec, coef_spec, coef_spec,
                      data_spec, data_spec],
            out_specs=[data_spec, data_spec],
        ),
        compiler_params=pltpu.CompilerParams(
            dimension_semantics=("parallel", "parallel"),
        ),
    )(a3, b3, da3, db3, x0v, x1v)

    xt = xt.reshape(B, D_pad)[:, :D].reshape(orig_shape)
    dxt = dxt.reshape(B, D_pad)[:, :D].reshape(orig_shape)
    return xt, dxt


def _reference_forward(x_0, x_1, t, scheme: str):
    """Pure-JAX reference matching AffineInterp.forward semantics."""
    B = x_0.shape[0]
    t32 = jnp.asarray(t, dtype=jnp.float32).reshape(-1)
    if t32.shape[0] == 1 and B != 1:
        t32 = jnp.broadcast_to(t32, (B,))
    a, b, da, db = _coefficients(t32, scheme)
    bshape = (B,) + (1,) * (x_0.ndim - 1)
    a = a.reshape(bshape)
    b = b.reshape(bshape)
    da = da.reshape(bshape)
    db = db.reshape(bshape)
    x0 = x_0.astype(jnp.float32)
    x1 = x_1.astype(jnp.float32)
    x_t = (a * x1 + b * x0).astype(x_0.dtype)
    dot_x_t = (da * x1 + db * x0).astype(x_0.dtype)
    return x_t, dot_x_t


if __name__ == "__main__":
    key = jax.random.PRNGKey(0)
    k0, k1, kt = jax.random.split(key, 3)

    B, C, H, W = 2, 4, 16, 16  # NCHW, C*H*W = 1024
    x_0 = jax.random.normal(k0, (B, C, H, W), dtype=jnp.float32)
    x_1 = jax.random.normal(k1, (B, C, H, W), dtype=jnp.float32)
    t = jax.random.uniform(kt, (B,), dtype=jnp.float32)

    ok = True
    for scheme in ("straight", "spherical", "ddim"):
        xt, dxt = affine_interp_forward(x_0, x_1, t, scheme=scheme)
        jax.block_until_ready((xt, dxt))
        xt_ref, dxt_ref = _reference_forward(x_0, x_1, t, scheme)
        ok &= bool(jnp.allclose(xt, xt_ref, atol=1e-5, rtol=1e-5))
        ok &= bool(jnp.allclose(dxt, dxt_ref, atol=1e-5, rtol=1e-5))

    # bf16 + non-multiple-of-128 feature size (exercises padding + batch fold).
    xb0 = jax.random.normal(k0, (4, 3, 10, 7), dtype=jnp.bfloat16)
    xb1 = jax.random.normal(k1, (4, 3, 10, 7), dtype=jnp.bfloat16)
    tb = jax.random.uniform(kt, (4,), dtype=jnp.float32)
    xt, dxt = affine_interp_forward(xb0, xb1, tb, scheme="spherical")
    jax.block_until_ready((xt, dxt))
    xt_ref, dxt_ref = _reference_forward(xb0, xb1, tb, "spherical")
    ok &= bool(jnp.allclose(xt.astype(jnp.float32), xt_ref.astype(jnp.float32),
                            atol=2e-2, rtol=2e-2))
    ok &= bool(jnp.allclose(dxt.astype(jnp.float32), dxt_ref.astype(jnp.float32),
                            atol=2e-2, rtol=2e-2))

    print("KERNEL_OK" if ok else "KERNEL_MISMATCH")
</pallas_src>

<mosaic_0001>
module attributes {stable_mosaic.version = 11 : i64} {
  func.func @_interp_kernel(%arg0: i32, %arg1: i32, %arg2: memref<2x1x1xf32, #tpu.memory_space<vmem>>, %arg3: memref<2x1x1xf32, #tpu.memory_space<vmem>>, %arg4: memref<2x1x1xf32, #tpu.memory_space<vmem>>, %arg5: memref<2x1x1xf32, #tpu.memory_space<vmem>>, %arg6: memref<2x8x128xf32, #tpu.memory_space<vmem>>, %arg7: memref<2x8x128xf32, #tpu.memory_space<vmem>>, %arg8: memref<2x8x128xf32, #tpu.memory_space<vmem>>, %arg9: memref<2x8x128xf32, #tpu.memory_space<vmem>>) attributes {dimension_semantics = [#tpu.dimension_semantics<parallel>, #tpu.dimension_semantics<parallel>], iteration_bounds = array<i64: 1, 1>, scalar_prefetch = 0 : i64, scratch_operands = 0 : i64, tpu.core_type = #tpu.core_type<tc>, window_params = [{transform_indices = @transform_0, window_bounds = array<i64: 2, 1, 1>}, {transform_indices = @transform_1, window_bounds = array<i64: 2, 1, 1>}, {transform_indices = @transform_2, window_bounds = array<i64: 2, 1, 1>}, {transform_indices = @transform_3, window_bounds = array<i64: 2, 1, 1>}, {transform_indices = @transform_4, window_bounds = array<i64: 2, 8, 128>}, {transform_indices = @transform_5, window_bounds = array<i64: 2, 8, 128>}, {transform_indices = @transform_6, window_bounds = array<i64: 2, 8, 128>}, {transform_indices = @transform_7, window_bounds = array<i64: 2, 8, 128>}]} {
    %c0 = arith.constant 0 : index
    %c0_0 = arith.constant 0 : index
    %c0_1 = arith.constant 0 : index
    %0 = vector.load %arg6[%c0, %c0_0, %c0_1] : memref<2x8x128xf32, #tpu.memory_space<vmem>>, vector<2x8x128xf32>
    %c0_2 = arith.constant 0 : index
    %c0_3 = arith.constant 0 : index
    %c0_4 = arith.constant 0 : index
    %1 = vector.load %arg7[%c0_2, %c0_3, %c0_4] : memref<2x8x128xf32, #tpu.memory_space<vmem>>, vector<2x8x128xf32>
    %c0_5 = arith.constant 0 : index
    %c0_6 = arith.constant 0 : index
    %c0_7 = arith.constant 0 : index
    %2 = vector.load %arg2[%c0_5, %c0_6, %c0_7] : memref<2x1x1xf32, #tpu.memory_space<vmem>>, vector<2x1x1xf32>
    %c0_8 = arith.constant 0 : index
    %c0_9 = arith.constant 0 : index
    %c0_10 = arith.constant 0 : index
    %3 = vector.load %arg3[%c0_8, %c0_9, %c0_10] : memref<2x1x1xf32, #tpu.memory_space<vmem>>, vector<2x1x1xf32>
    %c0_11 = arith.constant 0 : index
    %c0_12 = arith.constant 0 : index
    %c0_13 = arith.constant 0 : index
    %4 = vector.load %arg4[%c0_11, %c0_12, %c0_13] : memref<2x1x1xf32, #tpu.memory_space<vmem>>, vector<2x1x1xf32>
    %c0_14 = arith.constant 0 : index
    %c0_15 = arith.constant 0 : index
    %c0_16 = arith.constant 0 : index
    %5 = vector.load %arg5[%c0_14, %c0_15, %c0_16] : memref<2x1x1xf32, #tpu.memory_space<vmem>>, vector<2x1x1xf32>
    %6 = vector.broadcast %2 : vector<2x1x1xf32> to vector<2x8x128xf32>
    %7 = arith.mulf %6, %1 : vector<2x8x128xf32>
    %8 = vector.broadcast %3 : vector<2x1x1xf32> to vector<2x8x128xf32>
    %9 = arith.mulf %8, %0 : vector<2x8x128xf32>
    %10 = arith.addf %7, %9 : vector<2x8x128xf32>
    %c0_17 = arith.constant 0 : index
    %c0_18 = arith.constant 0 : index
    %c0_19 = arith.constant 0 : index
    %11 = vector.load %arg8[%c0_17, %c0_18, %c0_19] : memref<2x8x128xf32, #tpu.memory_space<vmem>>, vector<2x8x128xf32>
    tpu.vector_store %arg8[%c0_17, %c0_18, %c0_19], %10 {strides = array<i32>} : memref<2x8x128xf32, #tpu.memory_space<vmem>>, vector<2x8x128xf32>,
    %12 = vector.broadcast %4 : vector<2x1x1xf32> to vector<2x8x128xf32>
    %13 = arith.mulf %12, %1 : vector<2x8x128xf32>
    %14 = vector.broadcast %5 : vector<2x1x1xf32> to vector<2x8x128xf32>
    %15 = arith.mulf %14, %0 : vector<2x8x128xf32>
    %16 = arith.addf %13, %15 : vector<2x8x128xf32>
    %c0_20 = arith.constant 0 : index
    %c0_21 = arith.constant 0 : index
    %c0_22 = arith.constant 0 : index
    %17 = vector.load %arg9[%c0_20, %c0_21, %c0_22] : memref<2x8x128xf32, #tpu.memory_space<vmem>>, vector<2x8x128xf32>
    tpu.vector_store %arg9[%c0_20, %c0_21, %c0_22], %16 {strides = array<i32>} : memref<2x8x128xf32, #tpu.memory_space<vmem>>, vector<2x8x128xf32>,
    return
  }
  func.func @transform_0(%arg0: i32, %arg1: i32) -> (i32, i32, i32) {
    %c0_i32 = arith.constant 0 : i32
    %c0_i32_0 = arith.constant 0 : i32
    %c0_i32_1 = arith.constant 0 : i32
    return %arg0, %c0_i32, %c0_i32_0 : i32, i32, i32
  }
  func.func @transform_1(%arg0: i32, %arg1: i32) -> (i32, i32, i32) {
    %c0_i32 = arith.constant 0 : i32
    %c0_i32_0 = arith.constant 0 : i32
    %c0_i32_1 = arith.constant 0 : i32
    return %arg0, %c0_i32, %c0_i32_0 : i32, i32, i32
  }
  func.func @transform_2(%arg0: i32, %arg1: i32) -> (i32, i32, i32) {
    %c0_i32 = arith.constant 0 : i32
    %c0_i32_0 = arith.constant 0 : i32
    %c0_i32_1 = arith.constant 0 : i32
    return %arg0, %c0_i32, %c0_i32_0 : i32, i32, i32
  }
  func.func @transform_3(%arg0: i32, %arg1: i32) -> (i32, i32, i32) {
    %c0_i32 = arith.constant 0 : i32
    %c0_i32_0 = arith.constant 0 : i32
    %c0_i32_1 = arith.constant 0 : i32
    return %arg0, %c0_i32, %c0_i32_0 : i32, i32, i32
  }
  func.func @transform_4(%arg0: i32, %arg1: i32) -> (i32, i32, i32) {
    %c0_i32 = arith.constant 0 : i32
    %c0_i32_0 = arith.constant 0 : i32
    return %arg0, %arg1, %c0_i32 : i32, i32, i32
  }
  func.func @transform_5(%arg0: i32, %arg1: i32) -> (i32, i32, i32) {
    %c0_i32 = arith.constant 0 : i32
    %c0_i32_0 = arith.constant 0 : i32
    return %arg0, %arg1, %c0_i32 : i32, i32, i32
  }
  func.func @transform_6(%arg0: i32, %arg1: i32) -> (i32, i32, i32) {
    %c0_i32 = arith.constant 0 : i32
    %c0_i32_0 = arith.constant 0 : i32
    return %arg0, %arg1, %c0_i32 : i32, i32, i32
  }
  func.func @transform_7(%arg0: i32, %arg1: i32) -> (i32, i32, i32) {
    %c0_i32 = arith.constant 0 : i32
    %c0_i32_0 = arith.constant 0 : i32
    return %arg0, %arg1, %c0_i32 : i32, i32, i32
  }
}

</mosaic_0001>

<bundles_post_ra>
// kernel: tpu_custom_call.1
= control target key start
LH: loop header
LB: loop body
LE: loop exit
PB: predicated region body
PF: predicated region fallthrough
CT: control target
= control target key end

     0   :  { %13 = vsyncpa [#allocation3], 0  ;;  %s350_s0 = inlined_call_operand.vmem [shape: f32[2,1,1], index: 0, kind: input, shape index: {}]   ;;  %s351_s1 = inlined_call_operand.vmem [shape: f32[2,1,1], index: 1, kind: input, shape index: {}]   ;;  %s352_s2 = inlined_call_operand.vmem [shape: f32[2,1,1], index: 2, kind: input, shape index: {}]   ;;  %s353_s3 = inlined_call_operand.vmem [shape: f32[2,1,1], index: 3, kind: input, shape index: {}]   ;;  %s354_s4 = inlined_call_operand.vmem [shape: f32[2,8,128], index: 4, kind: input, shape index: {}]   ;;  %s355_s5 = inlined_call_operand.hbm [shape: f32[2,8,128], index: 5, kind: input, shape index: {}]   ;;  %s356_s6 = inlined_call_operand.hbm [shape: f32[2,8,128], index: 6, kind: output, shape index: {0}]   ;;  %s357_s7 = inlined_call_operand.hbm [shape: f32[2,8,128], index: 7, kind: output, shape index: {1}]  }
   0x1   :  { %14 = vsyncpa [#allocation4], 0 }
   0x2   :  { %15 = vsyncpa [#allocation7], 0  ;;  %s256_s24 = smov [#allocation2]  }
   0x3   :  { %s31_s25 = sshll.u32 %s256_s24, 4  ;;  %s32_s25 = int_to_ptr.vmem [resolvable:$true] %s31_s25 }
   0x4   :  { %s198_s26 = scalar_lea.vmem %s32_s25, 256  ;;  %p203_p1 = scmp.lt.s32.totalorder %s32_s25, %s32_s25 }
   0x5   :  { %p199_p0 = scmp.ne.s32.totalorder %s32_s25, %s198_s26  ;;  %p204_p2 = scmp.lt.s32.totalorder %s198_s26, %s198_s26 }
   0x7   :  { %p205_p3 = por %p204_p2, %p203_p1 }
   0x9   :  { %p206_p4 = pnand %p205_p3, %p199_p0 }
   0xb   :  { %209 = shalt.err (!%p206_p4)
}
   0xc   :  { %s257_s27 = smov 128   ;;  %s258_s28 = smov 8  }
   0xd   :  { %37 = dma.hbm_to_vmem [thread:$0]  %s355_s5, 256, %s32_s25, [#allocation3], %s257_s27, %s257_s27, %s258_s28  }
   0xe   :  { %250 = dma.done.wait [#allocation3], 256  }
   0xf   :  { %251 = vsyncadd [#allocation3], 4294967040  ;;  %v259_v0 = vmov 0   ;;  %v176_v1 = vld [vmem:[%s351_s1] ss:$0 sm:$0xff]  ;;  %v42_v15 = vld [vmem:[%s354_s4 + $0x8] sm:$0xff] }
  0x10   :  { %189 = vset.pattern.permute.xlu1 %v259_v0  ;;  %188 = vset.pattern.permute.xlu0 %v259_v0  ;;  %v174_v2 = vld [vmem:[%s350_s0] ss:$0 sm:$0xff]  ;;  %v177_v3 = vld [vmem:[%s351_s1 + $0x1] ss:$0 sm:$0xff]  ;;  %v44_v16 = vld [vmem:[#allocation2 + $0x8] sm:$0xff] }
  0x11   :  { %84 = vperm.xlu1 %189, %v176_v1   ;;  %64 = vperm.xlu0 %188, %v174_v2   ;;  %v175_v4 = vld [vmem:[%s350_s0 + $0x1] ss:$0 sm:$0xff]  ;;  %v178_v6 = vld [vmem:[%s352_s2] ss:$0 sm:$0xff] }
  0x12   :  { %v179_v5 = vld [vmem:[%s352_s2 + $0x1] ss:$0 sm:$0xff]  ;;  %v180_v8 = vld [vmem:[%s353_s3] ss:$0 sm:$0xff] }
  0x13   :  { %v181_v7 = vld [vmem:[%s353_s3 + $0x1] ss:$0 sm:$0xff]  ;;  %s260_s3 = smov [#allocation5]  }
  0x14   :  { %v41_v9 = vld [vmem:[%s354_s4] sm:$0xff]  ;;  %s146_s24 = sshll.u32 %s260_s3, 4  ;;  %s147_s24 = int_to_ptr.vmem [resolvable:$true] %s146_s24 }
  0x15   :  { %88 = vperm.xlu1 %189, %v177_v3   ;;  %68 = vperm.xlu0 %188, %v175_v4   ;;  %v43_v10 = vld [vmem:[#allocation2] sm:$0xff]  ;;  %s210_s25 = scalar_lea.vmem %s147_s24, 256  ;;  %p215_p6 = scmp.lt.s32.totalorder %s147_s24, %s147_s24 }
  0x16   :  { %p211_p5 = scmp.ne.s32.totalorder %s147_s24, %s210_s25  ;;  %p216_p7 = scmp.lt.s32.totalorder %s210_s25, %s210_s25 }
  0x18   :  { %p217_p8 = por %p216_p7, %p215_p6 }
  0x19   :  { %112 = vperm.xlu1 %189, %v179_v5   ;;  %108 = vperm.xlu0 %188, %v178_v6  }
  0x1a   :  { %p218_p9 = pnand %p217_p8, %p211_p5 }
  0x1d   :  { %132 = vperm.xlu1 %189, %v181_v7   ;;  %128 = vperm.xlu0 %188, %v180_v8  }
  0x8c   :  { %v85_v11 = vpop.permute.xlu1 %84  ;;  %v65_v12 = vpop.permute.xlu0 %64 }
  0x8d   :  { %v91_v13 = vmul.f32 %v85_v11, %v41_v9  ;;  %v71_v14 = vmul.f32 %v65_v12, %v43_v10 }
  0x8f   :  { %v93_v17 = vadd.f32 %v91_v13, %v71_v14 }
  0x90   :  { %v89_v18 = vpop.permute.xlu1 %88  ;;  %v69_v19 = vpop.permute.xlu0 %68 }
  0x91   :  { %95 = vst [vmem:[#allocation5] sm:$0xff] %v93_v17  ;;  %v92_v20 = vmul.f32 %v89_v18, %v42_v15  ;;  %v72_v21 = vmul.f32 %v69_v19, %v44_v16 }
  0x93   :  { %v94_v22 = vadd.f32 %v92_v20, %v72_v21 }
  0x94   :  { %v113_v23 = vpop.permute.xlu1 %112  ;;  %v109_v24 = vpop.permute.xlu0 %108 }
  0x95   :  { %96 = vst [vmem:[#allocation5 + $0x8] sm:$0xff] %v94_v22 }
  0x96   :  { %221 = shalt.err (!%p218_p9)
}
  0x97   :  { %152 = dma.vmem_to_hbm [thread:$0]  %s147_s24, 256, %s356_s6, [#allocation4], %s257_s27, %s257_s27, %s258_s28   ;;  %v116_v27 = vmul.f32 %v113_v23, %v44_v16  ;;  %v115_v28 = vmul.f32 %v109_v24, %v43_v10 }
  0x98   :  { %v133_v25 = vpop.permute.xlu1 %132  ;;  %v129_v26 = vpop.permute.xlu0 %128  ;;  %s261_s29 = smov [#allocation6]  }
  0x99   :  { %s158_s30 = sshll.u32 %s261_s29, 4  ;;  %v136_v29 = vmul.f32 %v133_v25, %v42_v15  ;;  %v135_v30 = vmul.f32 %v129_v26, %v41_v9  ;;  %s159_s30 = int_to_ptr.vmem [resolvable:$true] %s158_s30 }
  0x9a   :  { %s230_s8 = scalar_lea.vmem %s159_s30, 256  ;;  %p235_p11 = scmp.lt.s32.totalorder %s159_s30, %s159_s30 }
  0x9b   :  { %v138_v31 = vadd.f32 %v136_v29, %v116_v27  ;;  %v137_v32 = vadd.f32 %v135_v30, %v115_v28  ;;  %p231_p10 = scmp.ne.s32.totalorder %s159_s30, %s230_s8  ;;  %p236_p12 = scmp.lt.s32.totalorder %s230_s8, %s230_s8 }
  0x9d   :  { %140 = vst [vmem:[#allocation6 + $0x8] sm:$0xff] %v138_v31  ;;  %139 = vst [vmem:[#allocation6] sm:$0xff] %v137_v32  ;;  %p237_p13 = por %p236_p12, %p235_p11 }
  0x9f   :  { %p238_p0 = pnand %p237_p13, %p231_p10 }
  0xa1   :  { %241 = shalt.err (!%p238_p0)
}
  0xa2   :  { %164 = dma.vmem_to_hbm [thread:$0]  %s159_s30, 256, %s357_s7, [#allocation7], %s257_s27, %s257_s27, %s258_s28  }
  0xa3   :  { %252 = dma.done.wait [#allocation4], 256  }
  0xa4   :  { %253 = vsyncadd [#allocation4], 4294967040 }
  0xa5   :  { %254 = dma.done.wait [#allocation7], 256  }
  0xa6   :  { %255 = vsyncadd [#allocation7], 4294967040 }
  0xa7   :  { %171 = vsyncpa [#allocation3], 1 }
  0xa8   :  { %172 = vsyncpa [#allocation4], 1 }
  0xa9   :  { %173 = vsyncpa [#allocation7], 1 }

</bundles_post_ra>
